<compile_context>
chip_gen: v7x
topology: tpu7x:2x2x1
jax: 0.10.0
libtpu: 0.0.40
codegen_flags: <defaults>
</compile_context>

<pallas_src>
import functools

import jax
import jax.numpy as jnp
from jax.experimental import pallas as pl
from jax.experimental.pallas import tpu as pltpu


def _pool_kernel(x_ref, o_ref, acc_ref, *, hw, need_mask):
    # x_ref:   (1, TC, THW)  activation chunk (input dtype)
    # o_ref:   (1, 2, TC)    f32: row 0 = sum over HW, row 1 = max over HW
    # acc_ref: (2, TC) f32   row 0 = running sum, row 1 = running max
    k = pl.program_id(2)
    last = pl.num_programs(2) - 1

    @pl.when(k == 0)
    def _init():
        row = jax.lax.broadcasted_iota(jnp.int32, acc_ref.shape, 0)
        acc_ref[...] = jnp.where(row == 0, 0.0, -jnp.inf).astype(jnp.float32)

    def _accumulate(masked):
        xv = x_ref[...]                                   # (1, TC, THW), input dtype
        if masked:
            thw = xv.shape[-1]
            # (1, 1, THW) iota broadcast against the tile (not a full-tile iota).
            lane = jax.lax.broadcasted_iota(jnp.int32, (1, 1, thw), 2)
            valid = (k * thw + lane) < hw
            x_s = jnp.where(valid, xv, jnp.zeros((), xv.dtype))
            x_m = jnp.where(valid, xv, jnp.asarray(-jnp.inf, xv.dtype))
        else:
            x_s, x_m = xv, xv
        # Single pass over the loaded tile: one lane-reduce per statistic.
        # Sum accumulates in f32; max stays in the input dtype (exact), only the
        # tiny (1, TC) result is cast.
        s = jnp.sum(x_s, axis=-1, dtype=jnp.float32)       # (1, TC)
        m = jnp.max(x_m, axis=-1).astype(jnp.float32)      # (1, TC)
        prev = acc_ref[...]
        acc_ref[...] = jnp.concatenate(
            [prev[0:1, :] + s, jnp.maximum(prev[1:2, :], m)], axis=0)

    if need_mask:
        # Masking cost is only paid on the last (partial / zero-padded) chunk.
        @pl.when(k != last)
        def _steady():
            _accumulate(False)

        @pl.when(k == last)
        def _tail():
            _accumulate(True)
    else:
        _accumulate(False)

    @pl.when(k == last)
    def _finalize():
        o_ref[...] = acc_ref[...].reshape(o_ref.shape)


def channel_attention(x_nchw, w1, w2, *, tile_bytes=4 * 1024 * 1024):
    """x_nchw: (N, C, H, W) activations (f32 or bf16);
    w1: (C//16, C) fc1 weight; w2: (C, C//16) fc2 weight (1x1 conv weights squeezed).
    Returns (N, C, 1, 1) float32 sigmoid attention weights (PyTorch module returns
    the input dtype; f32 output here is intentional)."""
    N, C, H, W = x_nchw.shape
    Cr = w1.shape[0]
    assert w1.shape == (Cr, C) and w2.shape == (C, Cr)
    HW = H * W

    # Channels-second, flattened-spatial-last so the reduction axis maps to lanes.
    x_flat = x_nchw.reshape(N, C, HW)

    # Lane axis must host at least one full 128-lane tile (tiny pad, masked away).
    if HW < 128:
        x_flat = jnp.pad(x_flat, ((0, 0), (0, 0), (0, 128 - HW)))
    HW_pad = x_flat.shape[-1]

    # Channel blocking: adds a second "parallel" grid axis so v7x's two TensorCores
    # are both busy even for N == 1.  Block last dim must be a multiple of 128 (or C).
    if C > 128 and C % 128 == 0:
        tc = 128
    else:
        tc = C
    num_c = C // tc

    itemsize = jnp.dtype(x_flat.dtype).itemsize
    # Spatial tile: ~tile_bytes per in-flight buffer, multiple of 128 lanes,
    # balanced across chunks so the last chunk is not nearly empty.
    max_lanes = max(128, (tile_bytes // (tc * itemsize)) // 128 * 128)
    if HW_pad <= max_lanes:
        thw, num_k = HW_pad, 1              # single chunk: full extent, no constraint
    else:
        num_k = pl.cdiv(HW_pad, max_lanes)
        thw = ((pl.cdiv(HW_pad, num_k) + 127) // 128) * 128
        num_k = pl.cdiv(HW_pad, thw)
    # Mask whenever the grid covers lanes >= HW (HW<128 zero-pad OR ragged tail).
    need_mask = (num_k * thw) > HW

    kernel = functools.partial(_pool_kernel, hw=HW, need_mask=need_mask)

    x_tile_bytes = tc * thw * itemsize
    pooled = pl.pallas_call(
        kernel,
        out_shape=jax.ShapeDtypeStruct((N, 2, C), jnp.float32),
        grid=(N, num_c, num_k),
        in_specs=[
            pl.BlockSpec((1, tc, thw), lambda n, c, k: (n, c, k)),
        ],
        out_specs=pl.BlockSpec((1, 2, tc), lambda n, c, k: (n, 0, c)),
        scratch_shapes=[pltpu.VMEM((2, tc), jnp.float32)],
        compiler_params=pltpu.CompilerParams(
            dimension_semantics=("parallel", "parallel", "arbitrary"),
            # 2x headroom over the double-buffered input tile; stays well under
            # v7x's 64 MiB physical VMEM.
            vmem_limit_bytes=int(
                min(48 * 1024 * 1024, max(16 * 1024 * 1024, 4 * x_tile_bytes))),
        ),
        cost_estimate=pl.CostEstimate(
            flops=2 * N * C * HW,
            transcendentals=0,
            bytes_accessed=N * C * HW * itemsize + N * 2 * C * 4,
        ),
    )(x_flat)

    # Tiny fc1 -> ReLU -> fc2 -> sigmoid epilogue in plain XLA (perf-irrelevant;
    # keeping it out of the kernel enables the channel-parallel grid axis).
    avg = pooled[:, 0, :] * (1.0 / HW)       # divide by true HW once, at the end
    mx = pooled[:, 1, :]
    w1f = w1.astype(jnp.float32)
    w2f = w2.astype(jnp.float32)

    def mlp(p):
        return jnp.maximum(p @ w1f.T, 0.0) @ w2f.T

    out = jax.nn.sigmoid(mlp(avg) + mlp(mx))
    return out.reshape(N, C, 1, 1)


def _reference(x_nchw, w1, w2):
    xf = x_nchw.astype(jnp.float32)
    avg = jnp.mean(xf, axis=(2, 3))  # (N, C)
    mx = jnp.max(xf, axis=(2, 3))    # (N, C)

    def mlp(p):
        h = jnp.maximum(p @ w1.T, 0.0)
        return h @ w2.T

    return jax.nn.sigmoid(mlp(avg) + mlp(mx)).reshape(*avg.shape, 1, 1)


if __name__ == "__main__":
    key = jax.random.PRNGKey(0)

    # (N, C, H, W, activation dtype, tolerance, tile_bytes override).
    # C >= 16 because the module hard-codes C // 16.
    cases = [
        (2, 128, 16, 16, jnp.float32, 1e-5, None),        # aligned, single chunk
        (2, 64, 11, 11, jnp.float32, 1e-5, None),         # HW=121: padded + masked
        (2, 128, 40, 40, jnp.bfloat16, 1e-3, 128 * 1024), # bf16, multi-chunk + ragged tail
        (1, 256, 16, 16, jnp.float32, 1e-5, None),        # channel-blocked, N=1 (v7x case)
    ]

    for idx, (N, C, H, W, dtype, tol, tb) in enumerate(cases):
        kx, k1, k2, key = jax.random.split(key, 4)
        Cr = C // 16
        x = jax.random.normal(kx, (N, C, H, W), dtype=jnp.float32).astype(dtype)
        w1 = jax.random.normal(k1, (Cr, C), dtype=jnp.float32) * 0.1  # fc1 weight
        w2 = jax.random.normal(k2, (C, Cr), dtype=jnp.float32) * 0.1  # fc2 weight

        kwargs = {} if tb is None else {"tile_bytes": tb}
        out = jax.block_until_ready(channel_attention(x, w1, w2, **kwargs))
        ref = _reference(x, w1, w2)
        assert out.shape == (N, C, 1, 1)
        assert jnp.allclose(out, ref, atol=tol, rtol=tol), f"case {idx} mismatch"

    print("KERNEL_OK")
</pallas_src>

<mosaic_0001>
module attributes {stable_mosaic.version = 11 : i64} {
  func.func @_pool_kernel(%arg0: i32, %arg1: i32, %arg2: i32, %arg3: memref<1x128x256xf32, #tpu.memory_space<vmem>>, %arg4: memref<1x2x128xf32, #tpu.memory_space<vmem>>, %arg5: memref<2x128xf32, #tpu.memory_space<vmem>>) attributes {dimension_semantics = [#tpu.dimension_semantics<parallel>, #tpu.dimension_semantics<parallel>, #tpu.dimension_semantics<arbitrary>], iteration_bounds = array<i64: 2, 1, 1>, scalar_prefetch = 0 : i64, scratch_operands = 1 : i64, tpu.core_type = #tpu.core_type<tc>, window_params = [{transform_indices = @transform_0, window_bounds = array<i64: 1, 128, 256>}, {transform_indices = @transform_1, window_bounds = array<i64: 1, 2, 128>}]} {
    %c0_i32 = arith.constant 0 : i32
    %0 = arith.cmpi eq, %arg2, %c0_i32 : i32
    %1 = arith.extui %0 : i1 to i32
    %c0_i32_0 = arith.constant 0 : i32
    %2 = arith.cmpi ne, %1, %c0_i32_0 : i32
    scf.if %2 {
      %16 = tpu.iota {dimensions = array<i32: 0>} : vector<2x128xi32>
      %c0_i32_10 = arith.constant 0 : i32
      %17 = vector.broadcast %c0_i32_10 : i32 to vector<2x128xi32>
      %18 = arith.cmpi eq, %16, %17 : vector<2x128xi32>
      %cst_11 = arith.constant 0.000000e+00 : f32
      %cst_12 = arith.constant 0xFF800000 : f32
      %19 = vector.broadcast %cst_11 : f32 to vector<2x128xf32>
      %20 = vector.broadcast %cst_12 : f32 to vector<2x128xf32>
      %21 = arith.select %18, %19, %20 : vector<2x128xi1>, vector<2x128xf32>
      %c0_13 = arith.constant 0 : index
      %c0_14 = arith.constant 0 : index
      %22 = vector.load %arg5[%c0_13, %c0_14] : memref<2x128xf32, #tpu.memory_space<vmem>>, vector<2x128xf32>
      tpu.vector_store %arg5[%c0_13, %c0_14], %21 {strides = array<i32>} : memref<2x128xf32, #tpu.memory_space<vmem>>, vector<2x128xf32>,
    } else {
    }
    %c0 = arith.constant 0 : index
    %c0_1 = arith.constant 0 : index
    %c0_2 = arith.constant 0 : index
    %3 = vector.load %arg3[%c0, %c0_1, %c0_2] : memref<1x128x256xf32, #tpu.memory_space<vmem>>, vector<1x128x256xf32>
    %cst = arith.constant dense<0.000000e+00> : vector<1x128xf32>
    %4 = vector.multi_reduction <add>, %3, %cst [2] : vector<1x128x256xf32> to vector<1x128xf32>
    %cst_3 = arith.constant dense<0xFF800000> : vector<1x128xf32>
    %5 = vector.multi_reduction <maximumf>, %3, %cst_3 [2] : vector<1x128x256xf32> to vector<1x128xf32>
    %c0_4 = arith.constant 0 : index
    %c0_5 = arith.constant 0 : index
    %6 = vector.load %arg5[%c0_4, %c0_5] : memref<2x128xf32, #tpu.memory_space<vmem>>, vector<2x128xf32>
    %7 = vector.extract_strided_slice %6 {offsets = [0, 0], sizes = [1, 128], strides = [1, 1]} : vector<2x128xf32> to vector<1x128xf32>
    %8 = arith.addf %7, %4 : vector<1x128xf32>
    %9 = vector.extract_strided_slice %6 {offsets = [1, 0], sizes = [1, 128], strides = [1, 1]} : vector<2x128xf32> to vector<1x128xf32>
    %10 = arith.maximumf %9, %5 : vector<1x128xf32>
    %11 = tpu.concatenate %8, %10 in 0 : vector<1x128xf32>, vector<1x128xf32> -> vector<2x128xf32>
    %c0_6 = arith.constant 0 : index
    %c0_7 = arith.constant 0 : index
    %12 = vector.load %arg5[%c0_6, %c0_7] : memref<2x128xf32, #tpu.memory_space<vmem>>, vector<2x128xf32>
    tpu.vector_store %arg5[%c0_6, %c0_7], %11 {strides = array<i32>} : memref<2x128xf32, #tpu.memory_space<vmem>>, vector<2x128xf32>,
    %c0_i32_8 = arith.constant 0 : i32
    %13 = arith.cmpi eq, %arg2, %c0_i32_8 : i32
    %14 = arith.extui %13 : i1 to i32
    %c0_i32_9 = arith.constant 0 : i32
    %15 = arith.cmpi ne, %14, %c0_i32_9 : i32
    scf.if %15 {
      %c0_10 = arith.constant 0 : index
      %c0_11 = arith.constant 0 : index
      %16 = vector.load %arg5[%c0_10, %c0_11] : memref<2x128xf32, #tpu.memory_space<vmem>>, vector<2x128xf32>
      %17 = vector.shape_cast %16 : vector<2x128xf32> to vector<1x2x128xf32>
      %c0_12 = arith.constant 0 : index
      %c0_13 = arith.constant 0 : index
      %c0_14 = arith.constant 0 : index
      %18 = vector.load %arg4[%c0_12, %c0_13, %c0_14] : memref<1x2x128xf32, #tpu.memory_space<vmem>>, vector<1x2x128xf32>
      tpu.vector_store %arg4[%c0_12, %c0_13, %c0_14], %17 {strides = array<i32>} : memref<1x2x128xf32, #tpu.memory_space<vmem>>, vector<1x2x128xf32>,
    } else {
    }
    return
  }
  func.func @transform_0(%arg0: i32, %arg1: i32, %arg2: i32) -> (i32, i32, i32) {
    %c0_i32 = arith.constant 0 : i32
    return %arg0, %arg1, %arg2 : i32, i32, i32
  }
  func.func @transform_1(%arg0: i32, %arg1: i32, %arg2: i32) -> (i32, i32, i32) {
    %c0_i32 = arith.constant 0 : i32
    %c0_i32_0 = arith.constant 0 : i32
    return %arg0, %c0_i32, %arg1 : i32, i32, i32
  }
}

</mosaic_0001>

<bundles_post_ra>
// kernel: tpu_custom_call.1
= control target key start
LH: loop header
LB: loop body
LE: loop exit
PB: predicated region body
PF: predicated region fallthrough
CT: control target
= control target key end

     0   :  { %6 = vsyncpa [#allocation4], 0  ;;  %s1207_s0 = inlined_call_operand.hbm [shape: f32[2,128,256], index: 0, kind: input, shape index: {}]   ;;  %s1208_s1 = inlined_call_operand.hbm [shape: f32[2,2,128], index: 1, kind: output, shape index: {}]  }
   0x1   :  { %8 = vsyncpa [#allocation4 + $0x1], 0 }
   0x2   :  { %9 = vsyncpa [#allocation5], 0 }
   0x3   :  { %11 = vsyncpa [#allocation5 + $0x1], 0  ;;  %s850_s6 = smov 0   ;;  %s852_s7 = smov 0  }
   0x4   :  { %s854_s8 = smov 0   ;;  %s856_s9 = smov 0  }
   0x5   :  { %s858_s10 = smov 0   ;;  %s860_s11 = smov 0  }
   0x6 LB: > { %s641_s12 = sadd.s32 4294967295, %s833_s11   ;;  %s642_s13 = sadd.s32 4294967294, %s833_s11   ;;  %s833_s11 = sphi %s860_s11, %s17_s11   ;;  %s829_s10 = sphi %s858_s10, %s1223_s10   ;;  %s825_s9 = sphi %s856_s9, %s1222_s9   ;;  %s821_s8 = sphi %s854_s8, %s1221_s8   ;;  %s817_s7 = sphi %s852_s7, %s1220_s7   ;;  %s813_s6 = sphi %s850_s6, %s1219_s6  }
   0x7   : > { %s36_s14 = sadd.s32 1, %s829_s10  ;;  %s47_s15 = sadd.s32 1, %s821_s8 }
   0x8   : > { %p38_p0 = scmp.ge.s32.totalorder %s36_s14, 2  ;;  %p54_p1 = scmp.ne.s32.totalorder %s821_s8, %s817_s7 }
   0x9   : > { %p55_p2 = scmp.eq.s32.totalorder %s833_s11, 0  ;;  %p60_p3 = scmp.ne.s32.totalorder %s817_s7, %s813_s6 }
   0xa   : > { %s1225_s14 = smov (%p38_p0, %s36_s14), 0  ;;  %p61_p5 = scmp.eq.s32.totalorder %s641_s12, 0 }
   0xb   : > { %p891_p4 = por %p55_p2, %p54_p1  ;;  %s40_s17 = ssub.s32 %s829_s10, %s1225_s14 }
   0xc   : > { %p86_p6 = scmp.eq.s32.totalorder %s641_s12, 1  ;;  %p45_p7 = scmp.eq.s32.totalorder %s40_s17, 0 }
   0xd   : > { %p897_p8 = por %p61_p5, %p60_p3  ;;  %p92_p10 = scmp.eq.s32.totalorder %s642_s13, 1 }
   0xe   : > { %p901_p9 = por %p86_p6, %p54_p1  ;;  %p668_p13 = scmp.lt.s32.totalorder %s833_s11, 2 }
   0xf   : > { %s906_s20 = scalar_select %p45_p7, %s821_s8, %s47_s15  }
  0x10   : > { %s1212_s19 = scalar_select %p901_p9, 1, 0 }
  0x11   : > { %p908_p11 = por %p92_p10, %p60_p3  ;;  %s112_s22 = sand.u32 1, %s821_s8  }
  0x12   : > { %s645_s23 = sshll.u32 %s112_s22, 8  ;;  %s655_s24 = sshll.u32 %s829_s10, 12 }
  0x13   : > { %s1213_s21 = scalar_select %p908_p11, 1, 0 }
  0x14   : > { %s919_s27 = scalar_lea.hbm %s1207_s0, %s655_s24  ;;  %s116_s28 = scalar_lea.vmem [#allocation3], %s645_s23 }
  0x15   : > { %s128_s29 = sshll.u32 %s116_s28, 4  ;;  %p925_p0 = pnand %p668_p13, %p891_p4  ;;  %s921_s29 = int_to_ptr.vmem [resolvable:$true] %s128_s29 }
  0x16   : > { %s930_s2 = scalar_lea.sflag [#allocation4], %s112_s22  ;;  %s721_s3 = scalar_lea.hbm %s919_s27, 4096 }
  0x17   : > { %p722_p2 = scmp.ne.s32.totalorder %s919_s27, %s721_s3  ;;  %p723_p3 = pneg %p925_p0 }
  0x18   : > { %s726_s12 = scalar_lea.hbm %s1207_s0, 8192  ;;  %p727_p4 = scmp.lt.u32.totalorder %s919_s27, %s1207_s0 }
  0x19   : > { %p724_p5 = pnand %p723_p3, %p722_p2  ;;  %p728_p7 = scmp.lt.u32.totalorder %s726_s12, %s721_s3 }
  0x1a   : > { %p730_p13 = scmp.lt.u32.totalorder %s721_s3, %s919_s27 }
  0x1b   : > { %p725_p6 = pneg %p724_p5  ;;  %p729_p10 = por %p728_p7, %p727_p4 }
  0x1d   : > { %p731_p12 = por %p730_p13, %p729_p10 }
  0x1f   : > { %p732_p1 = pnand %p731_p12, %p725_p6 }
  0x21   : > { %735 = shalt.err (!%p732_p1)
}
  0x22   : > { %s736_s16 = scalar_lea.vmem %s921_s29, 4096  ;;  %s835_s17 = smov [#allocation3]  }
  0x23   : > { %p737_p2 = scmp.ne.s32.totalorder %s921_s29, %s736_s16  ;;  %s741_s22 = sshll.u32 %s835_s17, 4  ;;  %s742_s22 = int_to_ptr.vmem [resolvable:$false] %s741_s22 }
  0x24   : > { %s743_s23 = scalar_lea.vmem %s742_s22, 8192  ;;  %p744_p9 = scmp.lt.s32.totalorder %s921_s29, %s742_s22 }
  0x25   : > { %p739_p5 = pnand %p737_p2, %p723_p3  ;;  %p745_p4 = scmp.lt.s32.totalorder %s743_s23, %s736_s16 }
  0x27   : > { %p740_p11 = pneg %p739_p5  ;;  %p746_p7 = por %p745_p4, %p744_p9 }
  0x29   : > { %p747_p10 = pnand %p746_p7, %p740_p11 }
  0x2b   : > { %750 = shalt.err (!%p747_p10)
}
  0x2c   : > { %s836_s24 = smov 256   ;;  %s837_s25 = smov 16  }
  0x2d   : > { %663 = dma.hbm_to_vmem [thread:$0]  (!%p925_p0), %s919_s27, 4096, %s921_s29, %s930_s2, %s836_s24, %s836_s24, %s837_s25  }
  0x2e   : > { %p136_p12 = scmp.lt.s32.totalorder %s833_s11, 3  ;;  %p1215_p1 = scmp.ge.s32.totalorder %s833_s11, 1 }
  0x30   : > { %p137_p3 = pnand %p1215_p1, %p136_p12 }
  0x31   : > { %s962_s26 = sand.u32 (!%p137_p3), 1, %s817_s7  }
  0x32   : > { %140 = sbr.rel (%p137_p3) target bundleno = 291 (0x123), region = 24  ;;  %s649_s28 = sshll.u32 (!%p137_p3), %s962_s26, 8 }
  0x33   : > { %s143_s3 = scalar_lea.sflag (!%p137_p3), [#allocation4], %s962_s26  ;;  %s966_s4 = scalar_lea.vmem (!%p137_p3), [#allocation3], %s649_s28 }
  0x39   : > { %804 = dma.done.wait (%p897_p8), %s143_s3, 4096  }
  0x3a   : > { %806 = vsyncadd (%p897_p8), %s143_s3, 4294963200  ;;  %v176_v0 = vld [vmem:[%s966_s4] sm:$0xff]  ;;  %v177_v1 = vld [vmem:[%s966_s4 + $0x8] sm:$0xff]  ;;  %vm332_vm1 = vcmask 130112   ;;  %vm339_vm2 = vcmask 195712   ;;  %vm346_vm3 = vcmask 261312  }
  0x3b   : > { %v178_v2 = vld [vmem:[%s966_s4 + $0x10] sm:$0xff]  ;;  %v256_v3 = vmax.f32 %v176_v0, %v177_v1  ;;  %v208_v4 = vadd.f32 %v177_v1, %v176_v0  ;;  %v179_v5 = vld [vmem:[%s966_s4 + $0x18] sm:$0xff]  ;;  %v180_v8 = vld [vmem:[%s966_s4 + $0x20] sm:$0xff]  ;;  %v171_v0 = vlaneseq  ;;  %vm353_vm4 = vcmask 326912   ;;  %s650_s18 = sshll.u32 %s962_s26, 1  ;;  %s652_s27 = sshll.u32 %s825_s9, 5 }
  0x3c   : > { %v259_v6 = vmax.f32 %v178_v2, %v179_v5  ;;  %v211_v7 = vadd.f32 %v179_v5, %v178_v2  ;;  %v181_v9 = vld [vmem:[%s966_s4 + $0x28] sm:$0xff]  ;;  %v182_v12 = vld [vmem:[%s966_s4 + $0x30] sm:$0xff]  ;;  %v183_v13 = vld [vmem:[%s966_s4 + $0x38] sm:$0xff]  ;;  %v838_v2 = vmov -inf   ;;  %vm360_vm5 = vcmask 392512   ;;  %s164_s29 = scalar_lea.vmem [#allocation6], %s650_s18  ;;  %s1158_s12 = scalar_lea.hbm %s1208_s1, %s652_s27 }
  0x3d   : > { %257 = vmax.xlane.f32.xlu1 %v256_v3  ;;  %209 = vadd.xlane.f32.xlu0 %v208_v4  ;;  %v262_v10 = vmax.f32 %v180_v8, %v181_v9  ;;  %v214_v11 = vadd.f32 %v181_v9, %v180_v8  ;;  %v265_v14 = vmax.f32 %v182_v12, %v183_v13  ;;  %v184_v16 = vld [vmem:[%s966_s4 + $0x40] sm:$0xff]  ;;  %v185_v17 = vld [vmem:[%s966_s4 + $0x48] sm:$0xff]  ;;  %v186_v20 = vld [vmem:[%s966_s4 + $0x50] sm:$0xff]  ;;  %v1004_v1 = vshrl.u32 %v171_v0, 7  ;;  %s554_s30 = sshll.u32 %s164_s29, 4  ;;  %s540_s13 = scalar_lea.sflag [#allocation5], %s962_s26  ;;  %s1160_s30 = int_to_ptr.vmem [resolvable:$true] %s554_s30 }
  0x3e   : > { %v217_v15 = vadd.f32 %v183_v13, %v182_v12  ;;  %v268_v18 = vmax.f32 %v184_v16, %v185_v17  ;;  %v220_v19 = vadd.f32 %v185_v17, %v184_v16  ;;  %v187_v21 = vld [vmem:[%s966_s4 + $0x58] sm:$0xff]  ;;  %v188_v24 = vld [vmem:[%s966_s4 + $0x60] sm:$0xff]  ;;  %v189_v25 = vld [vmem:[%s966_s4 + $0x68] sm:$0xff]  ;;  %vm367_vm6 = vcmask 458112   ;;  %s751_s15 = scalar_lea.vmem %s1160_s30, 32  ;;  %p1216_p9 = scmp.ne.s32.totalorder %s1212_s19, 0 }
  0x3f   : > { %v271_v22 = vmax.f32 %v186_v20, %v187_v21  ;;  %v223_v23 = vadd.f32 %v187_v21, %v186_v20  ;;  %v274_v26 = vmax.f32 %v188_v24, %v189_v25  ;;  %v226_v27 = vadd.f32 %v189_v25, %v188_v24  ;;  %v190_v28 = vld [vmem:[%s966_s4 + $0x70] sm:$0xff]  ;;  %v191_v29 = vld [vmem:[%s966_s4 + $0x78] sm:$0xff]  ;;  %v192_v32 = vld [vmem:[%s966_s4 + $0x80] sm:$0xff]  ;;  %p752_p8 = scmp.ne.s32.totalorder %s1160_s30, %s751_s15  ;;  %s839_s9 = smov [#allocation6]  }
  0x40   : > { %v277_v30 = vmax.f32 %v190_v28, %v191_v29  ;;  %v229_v31 = vadd.f32 %v191_v29, %v190_v28  ;;  %v193_v33 = vld [vmem:[%s966_s4 + $0x88] sm:$0xff]  ;;  %v194_v36 = vld [vmem:[%s966_s4 + $0x90] sm:$0xff]  ;;  %v195_v37 = vld [vmem:[%s966_s4 + $0x98] sm:$0xff]  ;;  %vm173_vm0 = vcmp.eq.s32.totalorder %v1004_v1, 0  ;;  %vm374_vm7 = vcmask 523712   ;;  %s755_s16 = sshll.u32 %s839_s9, 4  ;;  %s756_s16 = int_to_ptr.vmem [resolvable:$false] %s755_s16 }
  0x41   : > { %260 = vmax.xlane.f32.xlu1 %v259_v6  ;;  %212 = vadd.xlane.f32.xlu0 %v211_v7  ;;  %v280_v34 = vmax.f32 %v192_v32, %v193_v33  ;;  %v232_v35 = vadd.f32 %v193_v33, %v192_v32  ;;  %v283_v38 = vmax.f32 %v194_v36, %v195_v37  ;;  %v196_v40 = vld [vmem:[%s966_s4 + $0xa0] sm:$0xff]  ;;  %v197_v41 = vld [vmem:[%s966_s4 + $0xa8] sm:$0xff]  ;;  %v198_v44 = vld [vmem:[%s966_s4 + $0xb0] sm:$0xff]  ;;  %v174_v3 = vsel %vm173_vm0, 0.0, %v838_v2  ;;  %p753_p11 = pnand %p752_p8, %p1216_p9  ;;  %s757_s17 = scalar_lea.vmem %s756_s16, 64 }
  0x42   : > { %v235_v39 = vadd.f32 %v195_v37, %v194_v36  ;;  %v286_v42 = vmax.f32 %v196_v40, %v197_v41  ;;  %v238_v43 = vadd.f32 %v197_v41, %v196_v40  ;;  %v199_v45 = vld [vmem:[%s966_s4 + $0xb8] sm:$0xff]  ;;  %v200_v48 = vld [vmem:[%s966_s4 + $0xc0] sm:$0xff]  ;;  %v201_v49 = vld [vmem:[%s966_s4 + $0xc8] sm:$0xff]  ;;  %175 = vst [vmem:[#allocation2] sm:$0x3] %v174_v3  ;;  %vm381_vm8 = vcmask 589312   ;;  %p758_p6 = scmp.lt.s32.totalorder %s1160_s30, %s756_s16  ;;  %p759_p13 = scmp.lt.s32.totalorder %s757_s17, %s751_s15 }
  0x43   : > { %v289_v46 = vmax.f32 %v198_v44, %v199_v45  ;;  %v241_v47 = vadd.f32 %v199_v45, %v198_v44  ;;  %v292_v50 = vmax.f32 %v200_v48, %v201_v49  ;;  %v244_v51 = vadd.f32 %v201_v49, %v200_v48  ;;  %v202_v52 = vld [vmem:[%s966_s4 + $0xd0] sm:$0xff]  ;;  %v203_v53 = vld [vmem:[%s966_s4 + $0xd8] sm:$0xff]  ;;  %v204_v56 = vld [vmem:[%s966_s4 + $0xe0] sm:$0xff]  ;;  %p754_p0 = pneg %p753_p11 }
  0x44   : > { %v295_v54 = vmax.f32 %v202_v52, %v203_v53  ;;  %v247_v55 = vadd.f32 %v203_v53, %v202_v52  ;;  %v205_v57 = vld [vmem:[%s966_s4 + $0xe8] sm:$0xff]  ;;  %v206_v60 = vld [vmem:[%s966_s4 + $0xf0] sm:$0xff]  ;;  %v207_v61 = vld [vmem:[%s966_s4 + $0xf8] sm:$0xff]  ;;  %vm388_vm9 = vcmask 654912   ;;  %vm395_vm10 = vcmask 720512   ;;  %p760_p2 = por %p759_p13, %p758_p6 }
  0x45   : > { %263 = vmax.xlane.f32.xlu1 %v262_v10  ;;  %215 = vadd.xlane.f32.xlu0 %v214_v11  ;;  %v298_v58 = vmax.f32 %v204_v56, %v205_v57  ;;  %v250_v59 = vadd.f32 %v205_v57, %v204_v56  ;;  %v301_v62 = vmax.f32 %v206_v60, %v207_v61  ;;  %vm402_vm11 = vcmask 786112  }
  0x46   : > { %v253_v63 = vadd.f32 %v207_v61, %v206_v60  ;;  %vm409_vm12 = vcmask 851712   ;;  %vm416_vm13 = vcmask 917312   ;;  %vm423_vm14 = vcmask 982912   ;;  %p761_p5 = pnand %p760_p2, %p754_p0 }
  0x47   : > { %vm430_vm15 = vcmask 1048512   ;;  %vm531_vm0 = vcmask 1040384  }
  0x49   : > { %266 = vmax.xlane.f32.xlu1 %v265_v14  ;;  %218 = vadd.xlane.f32.xlu0 %v217_v15 }
  0x4d   : > { %269 = vmax.xlane.f32.xlu1 %v268_v18  ;;  %221 = vadd.xlane.f32.xlu0 %v220_v19 }
  0x51   : > { %272 = vmax.xlane.f32.xlu1 %v271_v22  ;;  %224 = vadd.xlane.f32.xlu0 %v223_v23  ;;  %v322_v22 = vand.u32 127, %v171_v0 }
  0x53   : > { %v327_v23 = vadd.s32 4294967288, %v322_v22  ;;  %v334_v24 = vadd.s32 4294967280, %v322_v22  ;;  %v341_v25 = vadd.s32 4294967272, %v322_v22  ;;  %v348_v28 = vadd.s32 4294967264, %v322_v22 }
  0x54   : > { %v325_v29 = vsub.s32 %v322_v22, %v1004_v1  ;;  %v362_v33 = vadd.s32 4294967248, %v322_v22  ;;  %v376_v36 = vadd.s32 4294967232, %v322_v22  ;;  %v383_v37 = vadd.s32 4294967224, %v322_v22 }
  0x55   : > { %275 = vmax.xlane.f32.xlu1 %v274_v26  ;;  %227 = vadd.xlane.f32.xlu0 %v226_v27  ;;  %v337_v32 = vsub.s32 %v334_v24, %v1004_v1  ;;  %v351_v40 = vsub.s32 %v348_v28, %v1004_v1  ;;  %v390_v41 = vadd.s32 4294967216, %v322_v22  ;;  %v404_v44 = vadd.s32 4294967200, %v322_v22 }
  0x56   : > { %v411_v45 = vadd.s32 4294967192, %v322_v22  ;;  %v1060_v48 = vsub.s32 %v376_v36, %v1004_v1  ;;  %v1063_v49 = vsub.s32 %v383_v37, %v1004_v1  ;;  %v418_v52 = vadd.s32 4294967184, %v322_v22 }
  0x57   : > { %v425_v53 = vadd.s32 4294967176, %v322_v22  ;;  %v1072_v56 = vsub.s32 %v390_v41, %v1004_v1  ;;  %v1080_v60 = vsub.s32 %v404_v44, %v1004_v1 }
  0x58   : > { %v1083_v61 = vsub.s32 %v411_v45, %v1004_v1 }
  0x59   : > { %278 = vmax.xlane.f32.xlu1 %v277_v30  ;;  %230 = vadd.xlane.f32.xlu0 %v229_v31  ;;  %v355_v30 = vadd.s32 4294967256, %v322_v22  ;;  %v330_v31 = vsub.s32 %v327_v23, %v1004_v1 }
  0x5d   : > { %281 = vmax.xlane.f32.xlu1 %v280_v34  ;;  %233 = vadd.xlane.f32.xlu0 %v232_v35  ;;  %v369_v34 = vadd.s32 4294967240, %v322_v22  ;;  %v344_v35 = vsub.s32 %v341_v25, %v1004_v1 }
  0x61   : > { %284 = vmax.xlane.f32.xlu1 %v283_v38  ;;  %236 = vadd.xlane.f32.xlu0 %v235_v39 }
  0x65   : > { %287 = vmax.xlane.f32.xlu1 %v286_v42  ;;  %239 = vadd.xlane.f32.xlu0 %v238_v43  ;;  %v397_v42 = vadd.s32 4294967208, %v322_v22  ;;  %v358_v43 = vsub.s32 %v355_v30, %v1004_v1  ;;  %v1095_v22 = vsub.s32 %v425_v53, %v1004_v1 }
  0x67   : > { %v1075_v57 = vsub.s32 %v397_v42, %v1004_v1 }
  0x69   : > { %290 = vmax.xlane.f32.xlu1 %v289_v46  ;;  %242 = vadd.xlane.f32.xlu0 %v241_v47  ;;  %v365_v46 = vsub.s32 %v362_v33, %v1004_v1  ;;  %v372_v47 = vsub.s32 %v369_v34, %v1004_v1 }
  0x6d   : > { %293 = vmax.xlane.f32.xlu1 %v292_v50  ;;  %245 = vadd.xlane.f32.xlu0 %v244_v51 }
  0x71   : > { %296 = vmax.xlane.f32.xlu1 %v295_v54  ;;  %248 = vadd.xlane.f32.xlu0 %v247_v55 }
  0x75   : > { %299 = vmax.xlane.f32.xlu1 %v298_v58  ;;  %251 = vadd.xlane.f32.xlu0 %v250_v59 }
  0x79   : > { %302 = vmax.xlane.f32.xlu1 %v301_v62  ;;  %254 = vadd.xlane.f32.xlu0 %v253_v63 }
  0xca   : > { %v1007_v4 = vpop.xlane.xlu1 %257  ;;  %v1009_v5 = vpop.xlane.xlu0 %209 }
  0xcb   : > { %v453_v62 = vrot.slane %v1007_v4, %v325_v29  ;;  %v326_v63 = vrot.slane %v1009_v5, %v325_v29 }
  0xce   : > { %v1011_v6 = vpop.xlane.xlu1 %260  ;;  %v1013_v7 = vpop.xlane.xlu0 %212 }
  0xcf   : > { %v457_v54 = vrot.slane %v1011_v6, %v330_v31  ;;  %v331_v55 = vrot.slane %v1013_v7, %v330_v31 }
  0xd1   : > { %v458_v4 = vsel %vm332_vm1, %v457_v54, %v453_v62  ;;  %v333_v5 = vsel %vm332_vm1, %v331_v55, %v326_v63 }
  0xd2   : > { %v1015_v8 = vpop.xlane.xlu1 %263  ;;  %v1017_v9 = vpop.xlane.xlu0 %215 }
  0xd3   : > { %v462_v58 = vrot.slane %v1015_v8, %v337_v32  ;;  %v338_v59 = vrot.slane %v1017_v9, %v337_v32  ;;  %v1092_v9 = vsub.s32 %v418_v52, %v1004_v1 }
  0xd6   : > { %v1019_v10 = vpop.xlane.xlu1 %266  ;;  %v1021_v11 = vpop.xlane.xlu0 %218 }
  0xd7   : > { %v467_v0 = vrot.slane %v1019_v10, %v344_v35  ;;  %v345_v2 = vrot.slane %v1021_v11, %v344_v35 }
  0xda   : > { %v1023_v12 = vpop.xlane.xlu1 %269  ;;  %v1025_v13 = vpop.xlane.xlu0 %221 }
  0xdb   : > { %v472_v3 = vrot.slane %v1023_v12, %v351_v40  ;;  %v352_v6 = vrot.slane %v1025_v13, %v351_v40  ;;  %v463_v12 = vsel %vm339_vm2, %v462_v58, %v458_v4  ;;  %v340_v13 = vsel %vm339_vm2, %v338_v59, %v333_v5 }
  0xdc   : > { %v468_v1 = vsel %vm346_vm3, %v467_v0, %v463_v12  ;;  %v347_v25 = vsel %vm346_vm3, %v345_v2, %v340_v13 }
  0xdd   : > { %v354_v29 = vsel %vm353_vm4, %v352_v6, %v347_v25 }
  0xde   : > { %v1027_v14 = vpop.xlane.xlu1 %272  ;;  %v1029_v15 = vpop.xlane.xlu0 %224 }
  0xdf   : > { %v477_v10 = vrot.slane %v1027_v14, %v358_v43  ;;  %v359_v11 = vrot.slane %v1029_v15, %v358_v43  ;;  %v473_v15 = vsel %vm353_vm4, %v472_v3, %v468_v1 }
  0xe1   : > { %v478_v32 = vsel %vm360_vm5, %v477_v10, %v473_v15  ;;  %v361_v33 = vsel %vm360_vm5, %v359_v11, %v354_v29 }
  0xe2   : > { %v1031_v16 = vpop.xlane.xlu1 %275  ;;  %v1033_v17 = vpop.xlane.xlu0 %227 }
  0xe3   : > { %v482_v23 = vrot.slane %v1031_v16, %v365_v46  ;;  %v366_v24 = vrot.slane %v1033_v17, %v365_v46 }
  0xe5   : > { %v483_v34 = vsel %vm367_vm6, %v482_v23, %v478_v32  ;;  %v368_v35 = vsel %vm367_vm6, %v366_v24, %v361_v33 }
  0xe6   : > { %v1035_v18 = vpop.xlane.xlu1 %278  ;;  %v1037_v19 = vpop.xlane.xlu0 %230 }
  0xe7   : > { %v487_v28 = vrot.slane %v1035_v18, %v372_v47  ;;  %v373_v14 = vrot.slane %v1037_v19, %v372_v47 }
  0xe9   : > { %v488_v36 = vsel %vm374_vm7, %v487_v28, %v483_v34  ;;  %v375_v37 = vsel %vm374_vm7, %v373_v14, %v368_v35 }
  0xea   : > { %v1039_v20 = vpop.xlane.xlu1 %281  ;;  %v1041_v21 = vpop.xlane.xlu0 %233 }
  0xeb   : > { %v492_v30 = vrot.slane %v1039_v20, %v1060_v48  ;;  %v380_v16 = vrot.slane %v1041_v21, %v1060_v48 }
  0xed   : > { %v493_v40 = vsel %vm381_vm8, %v492_v30, %v488_v36  ;;  %v382_v41 = vsel %vm381_vm8, %v380_v16, %v375_v37 }
  0xee   : > { %v1043_v26 = vpop.xlane.xlu1 %284  ;;  %v1045_v27 = vpop.xlane.xlu0 %236 }
  0xef   : > { %v497_v18 = vrot.slane %v1043_v26, %v1063_v49  ;;  %v387_v19 = vrot.slane %v1045_v27, %v1063_v49 }
  0xf1   : > { %v498_v44 = vsel %vm388_vm9, %v497_v18, %v493_v40  ;;  %v389_v45 = vsel %vm388_vm9, %v387_v19, %v382_v41 }
  0xf2   : > { %v1051_v38 = vpop.xlane.xlu1 %287  ;;  %v1053_v39 = vpop.xlane.xlu0 %239 }
  0xf3   : > { %v502_v20 = vrot.slane %v1051_v38, %v1072_v56  ;;  %v394_v21 = vrot.slane %v1053_v39, %v1072_v56 }
  0xf5   : > { %v503_v48 = vsel %vm395_vm10, %v502_v20, %v498_v44  ;;  %v396_v49 = vsel %vm395_vm10, %v394_v21, %v389_v45 }
  0xf6   : > { %v1065_v50 = vpop.xlane.xlu1 %290  ;;  %v1067_v51 = vpop.xlane.xlu0 %242 }
  0xf7   : > { %v507_v26 = vrot.slane %v1065_v50, %v1075_v57  ;;  %v401_v27 = vrot.slane %v1067_v51, %v1075_v57 }
  0xf9   : > { %v508_v52 = vsel %vm402_vm11, %v507_v26, %v503_v48  ;;  %v403_v53 = vsel %vm402_vm11, %v401_v27, %v396_v49 }
  0xfa   : > { %v294_v7 = vpop.xlane.xlu1 %293  ;;  %v246_v8 = vpop.xlane.xlu0 %245 }
  0xfb   : > { %v512_v42 = vrot.slane %v294_v7, %v1080_v60  ;;  %v408_v38 = vrot.slane %v246_v8, %v1080_v60  ;;  %v304_v60 = vld [vmem:[#allocation2] sm:$0x3] }
  0xfd   : > { %v513_v54 = vsel %vm409_vm12, %v512_v42, %v508_v52  ;;  %v410_v55 = vsel %vm409_vm12, %v408_v38, %v403_v53 }
  0xfe   : > { %v297_v17 = vpop.xlane.xlu1 %296  ;;  %v249_v31 = vpop.xlane.xlu0 %248 }
  0xff   : > { %v517_v46 = vrot.slane %v297_v17, %v1083_v61  ;;  %v415_v47 = vrot.slane %v249_v31, %v1083_v61 }
 0x101   : > { %v518_v58 = vsel %vm416_vm13, %v517_v46, %v513_v54  ;;  %v417_v59 = vsel %vm416_vm13, %v415_v47, %v410_v55 }
 0x102   : > { %v300_v43 = vpop.xlane.xlu1 %299  ;;  %v252_v39 = vpop.xlane.xlu0 %251 }
 0x103   : > { %v522_v50 = vrot.slane %v300_v43, %v1092_v9  ;;  %v422_v51 = vrot.slane %v252_v39, %v1092_v9 }
 0x105   : > { %v523_v63 = vsel %vm423_vm14, %v522_v50, %v518_v58  ;;  %v424_v0 = vsel %vm423_vm14, %v422_v51, %v417_v59 }
 0x106   : > { %v303_v56 = vpop.xlane.xlu1 %302  ;;  %v255_v57 = vpop.xlane.xlu0 %254 }
 0x107   : > { %v527_v61 = vrot.slane %v303_v56, %v1095_v22  ;;  %v429_v62 = vrot.slane %v255_v57, %v1095_v22 }
 0x109   : > { %v528_v2 = vsel %vm430_vm15, %v527_v61, %v523_v63  ;;  %v431_v3 = vsel %vm430_vm15, %v429_v62, %v424_v0 }
 0x10a   : > { %v530_v6 = vmax.f32 %v304_v60, %v528_v2  ;;  %v433_v7 = vadd.f32 %v431_v3, %v304_v60 }
 0x10c   : > { %v532_v8 = vsel %vm531_vm0, %v433_v7, %v530_v6 }
 0x10d   : > { %533 = vst [vmem:[#allocation2] sm:$0x3] %v532_v8 }
 0x114   : > { %v537_v9 = vld [vmem:[#allocation2] sm:$0x3] }
 0x115   : > { %538 = vst [vmem:[%s164_s29] sm:$0x3] %v537_v9 }
 0x116   : > { %764 = shalt.err (!%p761_p5)
}
 0x117   : > { %s765_s22 = scalar_lea.hbm %s1158_s12, 32  ;;  %s769_s25 = scalar_lea.hbm %s1208_s1, 64 }
 0x118   : > { %p766_p4 = scmp.ne.s32.totalorder %s1158_s12, %s765_s22  ;;  %p770_p12 = scmp.lt.u32.totalorder %s1158_s12, %s1208_s1 }
 0x119   : > { %p771_p1 = scmp.lt.u32.totalorder %s769_s25, %s765_s22  ;;  %p773_p8 = scmp.lt.u32.totalorder %s765_s22, %s1158_s12 }
 0x11a   : > { %p767_p7 = pnand %p766_p4, %p1216_p9 }
 0x11b   : > { %p772_p3 = por %p771_p1, %p770_p12 }
 0x11c   : > { %p768_p10 = pneg %p767_p7 }
 0x11d   : > { %p774_p11 = por %p773_p8, %p772_p3 }
 0x11f   : > { %p775_p0 = pnand %p774_p11, %p768_p10 }
 0x121   : > { %778 = shalt.err (!%p775_p0)
}
 0x122   : > { %658 = dma.vmem_to_hbm [thread:$0]  (%p1216_p9), %s1160_s30, 32, %s1158_s12, %s540_s13  }
 0x123 PF: > { %s566_s3 = sand.u32 1, %s813_s6   ;;  %p1217_p6 = scmp.ne.s32.totalorder %s1213_s21, 0 }
 0x124   : > { %p1218_p13 = scmp.ge.s32.totalorder %s833_s11, 2  ;;  %s567_s4 = scalar_lea.sflag [#allocation5], %s566_s3 }
 0x126   : > { %p665_p2 = pnand %p1218_p13, %p1217_p6 }
 0x128   : > { %808 = dma.done.wait (!%p665_p2), %s567_s4, 32  }
 0x129   : > { %810 = vsyncadd (!%p665_p2), %s567_s4, 4294967264  ;;  %s17_s11 = sadd.s32 1, %s833_s11   ;;  %s1219_s6 = smov %s817_s7 }
 0x12a   : > { %p14_p5 = scmp.ge.s32.totalorder %s17_s11, 4   ;;  %s1220_s7 = smov %s821_s8 }
 0x12b   : > { %s1221_s8 = smov %s906_s20  ;;  %s1222_s9 = smov %s829_s10 }
 0x12c   : > { %s1223_s10 = smov %s1225_s14  ;;  %16 = sbr.rel (!%p14_p5) target bundleno = 6 (0x6), region = 77 }
 0x133   :  { %572 = vsyncpa [#allocation4], 1 }
 0x134   :  { %574 = vsyncpa [#allocation4 + $0x1], 1 }
 0x135   :  { %575 = vsyncpa [#allocation5], 1 }
 0x136   :  { %577 = vsyncpa [#allocation5 + $0x1], 1 }

</bundles_post_ra>
